<compile_context>
chip_gen: v6e
topology: v6e:2x2x1
jax: 0.10.0
libtpu: 0.0.40
codegen_flags: <defaults>
</compile_context>

<pallas_src>
import jax
import jax.numpy as jnp
from jax.experimental import pallas as pl
from jax.experimental.pallas import tpu as pltpu

EPS = 1e-5
LANES = 128
VMEM_LIMIT = 32 * 1024 * 1024


# ------------------------------------------------------------------ helpers

def _round_up(x, m):
    return (x + m - 1) // m * m


def _pick_tile(m):
    """Largest row tile that divides M exactly, preferring >=2 grid steps so the
    'parallel' grid axis can feed both TensorCores on v7x.  Falls back to the
    full extent for tiny / awkward M (always legal, avoids padded rows that
    would corrupt the BN statistics)."""
    for t in (1024, 512, 256, 128, 64, 32, 16, 8):
        if m % t == 0 and m // t >= 2:
            return t
    for t in (1024, 512, 256, 128, 64, 32, 16, 8):
        if m % t == 0:
            return t
    return m


# ------------------------------------------------------------------ Pallas kernels

def _conv_mm_stats_kernel(a_ref, w_ref, b_ref, y_ref, s_ref, ss_ref):
    """y = relu(a @ w + b) plus per-tile channel stats.

    a:[tm,K] w:[K,Cp] b:[1,Cp] -> y:[tm,Cp],
    s:[1,1,Cp]  per-tile sum,
    ss:[1,1,Cp] per-tile sum-of-squares centred on the *tile* mean
    (combined with Chan's formula in a tiny JAX epilogue)."""
    y = jnp.dot(a_ref[...], w_ref[...], preferred_element_type=jnp.float32)
    y = jnp.maximum(y + b_ref[...], 0.0)
    y_ref[...] = y
    tm = y.shape[0]
    s = jnp.sum(y, axis=0, keepdims=True)             # [1, Cp]
    mu = s * (1.0 / tm)
    d = y - mu
    ss = jnp.sum(d * d, axis=0, keepdims=True)        # [1, Cp]
    s_ref[...] = s[None]                              # [1, 1, Cp]
    ss_ref[...] = ss[None]


def _bn_apply_kernel(y_ref, sc_ref, sh_ref, o_ref):
    o_ref[...] = y_ref[...] * sc_ref[...] + sh_ref[...]


def _bn_apply_res_kernel(y_ref, sc_ref, sh_ref, r_ref, o_ref):
    o_ref[...] = y_ref[...] * sc_ref[...] + sh_ref[...] + r_ref[...]


# ------------------------------------------------------------------ Pallas wrappers

def conv_matmul_stats(a, w, b):
    """a:[M,K] w:[K,Cp] b:[1,Cp] -> (y:[M,Cp], tile_sum:[T,1,Cp], tile_css:[T,1,Cp])."""
    M, K = a.shape
    Cp = w.shape[1]
    tm = _pick_tile(M)
    T = M // tm
    return pl.pallas_call(
        _conv_mm_stats_kernel,
        out_shape=(jax.ShapeDtypeStruct((M, Cp), jnp.float32),
                   jax.ShapeDtypeStruct((T, 1, Cp), jnp.float32),
                   jax.ShapeDtypeStruct((T, 1, Cp), jnp.float32)),
        grid_spec=pltpu.PrefetchScalarGridSpec(
            num_scalar_prefetch=0,
            grid=(T,),
            in_specs=[
                pl.BlockSpec((tm, K), lambda i: (i, 0)),
                pl.BlockSpec((K, Cp), lambda i: (0, 0)),
                pl.BlockSpec((1, Cp), lambda i: (0, 0)),
            ],
            out_specs=(pl.BlockSpec((tm, Cp), lambda i: (i, 0)),
                       pl.BlockSpec((1, 1, Cp), lambda i: (i, 0, 0)),
                       pl.BlockSpec((1, 1, Cp), lambda i: (i, 0, 0))),
        ),
        compiler_params=pltpu.CompilerParams(
            dimension_semantics=("parallel",),
            vmem_limit_bytes=VMEM_LIMIT),
    )(a, w, b)


def bn_apply(y, scale, shift, residual=None):
    """y:[M,Cp] * scale[1,Cp] + shift[1,Cp] (+ residual[M,Cp]) -- lane-dense."""
    M, Cp = y.shape
    tm = _pick_tile(M)
    row_spec = pl.BlockSpec((tm, Cp), lambda i: (i, 0))
    chan_spec = pl.BlockSpec((1, Cp), lambda i: (0, 0))
    if residual is None:
        kernel = _bn_apply_kernel
        in_specs = [row_spec, chan_spec, chan_spec]
        args = (y, scale, shift)
    else:
        kernel = _bn_apply_res_kernel
        in_specs = [row_spec, chan_spec, chan_spec, row_spec]
        args = (y, scale, shift, residual)
    return pl.pallas_call(
        kernel,
        out_shape=jax.ShapeDtypeStruct((M, Cp), jnp.float32),
        grid_spec=pltpu.PrefetchScalarGridSpec(
            num_scalar_prefetch=0,
            grid=(M // tm,),
            in_specs=in_specs,
            out_specs=row_spec,
        ),
        compiler_params=pltpu.CompilerParams(
            dimension_semantics=("parallel",),
            vmem_limit_bytes=VMEM_LIMIT),
    )(*args)


# ------------------------------------------------------------------ JAX glue

def _im2col(x_nhwc, stride):
    """3x3, pad=1 patch extraction.  Returns [N*Ho*Wo, 9*Cin] and (N,Ho,Wo)."""
    N, H, W, Cin = x_nhwc.shape
    Ho = (H + 2 - 3) // stride + 1
    Wo = (W + 2 - 3) // stride + 1
    xp = jnp.pad(x_nhwc, ((0, 0), (1, 1), (1, 1), (0, 0)))
    cols = []
    for dy in range(3):
        for dx in range(3):
            cols.append(xp[:, dy:dy + (Ho - 1) * stride + 1:stride,
                           dx:dx + (Wo - 1) * stride + 1:stride, :])
    p = jnp.stack(cols, axis=3)                     # [N,Ho,Wo,9,Cin]
    return p.reshape(N * Ho * Wo, 9 * Cin), (N, Ho, Wo)


def _bn_scale_shift(tile_sum, tile_css, tm, gamma_p, beta_p):
    """Chan's parallel combine of per-tile partials -> BN scale/shift [1,Cp]."""
    s = tile_sum[:, 0, :]                                    # [T, Cp]
    css = tile_css[:, 0, :]                                  # [T, Cp]
    T = s.shape[0]
    m = T * tm
    mean = jnp.sum(s, axis=0, keepdims=True) / m             # [1, Cp]
    mu_t = s / tm                                            # [T, Cp]
    var = (jnp.sum(css, axis=0, keepdims=True)
           + tm * jnp.sum((mu_t - mean) ** 2, axis=0, keepdims=True)) / m
    inv = gamma_p / jnp.sqrt(var + EPS)
    return inv, beta_p - mean * inv                          # scale, shift


def conv_block(x_nhwc, w_oihw, bias, gamma, beta, stride, residual_flat=None):
    """conv3x3(stride,pad=1) -> ReLU -> BatchNorm(training stats) [+ residual].

    Returns (out_nhwc [N,Ho,Wo,Cout], out_flat_padded [M, 128-padded C])."""
    Cout = w_oihw.shape[0]
    Cp = _round_up(Cout, LANES)

    patches, (N, Ho, Wo) = _im2col(x_nhwc, stride)                       # [M, 9*Cin]

    # Lane-dense (128) channel padding for weights / bias / affine params.
    w_mat = jnp.transpose(w_oihw, (2, 3, 1, 0)).reshape(-1, Cout)        # [9*Cin, Cout]
    w_mat = jnp.pad(w_mat, ((0, 0), (0, Cp - Cout)))
    b_p = jnp.pad(bias.reshape(1, Cout), ((0, 0), (0, Cp - Cout)))
    g_p = jnp.pad(gamma.reshape(1, Cout), ((0, 0), (0, Cp - Cout)))
    be_p = jnp.pad(beta.reshape(1, Cout), ((0, 0), (0, Cp - Cout)))

    y, t_sum, t_css = conv_matmul_stats(patches, w_mat, b_p)             # fused pass 1
    tm = y.shape[0] // t_sum.shape[0]
    scale, shift = _bn_scale_shift(t_sum, t_css, tm, g_p, be_p)          # tiny epilogue
    out_flat = bn_apply(y, scale, shift, residual_flat)                  # fused pass 2

    out_nhwc = out_flat[:, :Cout].reshape(N, Ho, Wo, Cout)
    return out_nhwc, out_flat


def conv_res_block_forward(x_nchw, params):
    """ConvResBlock.forward.  x: NCHW -> NCHW."""
    x = jnp.transpose(x_nchw, (0, 2, 3, 1))                              # -> NHWC
    h_nhwc, h_flat = conv_block(x, *params["conv"], stride=2)            # ConvBlock(inc,outc,2)
    t_nhwc, _ = conv_block(h_nhwc, *params["res1"], stride=1)            # ResBlock.conv1
    o_nhwc, _ = conv_block(t_nhwc, *params["res2"], stride=1,
                           residual_flat=h_flat)                         # ResBlock.conv2 + skip
    return jnp.transpose(o_nhwc, (0, 3, 1, 2))                           # -> NCHW


# ------------------------------------------------------------------ reference (pure JAX)

def _conv_block_ref(x_nchw, w, b, gamma, beta, stride):
    y = jax.lax.conv_general_dilated(
        x_nchw, w, (stride, stride), ((1, 1), (1, 1)),
        dimension_numbers=("NCHW", "OIHW", "NCHW"))
    y = y + b[None, :, None, None]
    y = jnp.maximum(y, 0.0)
    mean = y.mean(axis=(0, 2, 3), keepdims=True)
    var = y.var(axis=(0, 2, 3), keepdims=True)
    return (y - mean) / jnp.sqrt(var + EPS) * gamma[None, :, None, None] + beta[None, :, None, None]


def _ref_forward(x_nchw, params):
    h = _conv_block_ref(x_nchw, *params["conv"], stride=2)
    t = _conv_block_ref(h, *params["res1"], stride=1)
    return h + _conv_block_ref(t, *params["res2"], stride=1)


# ------------------------------------------------------------------ param init (deterministic)

def _init_conv(key, inc, outc):
    kw, kb = jax.random.split(key)
    fan_in = inc * 9
    bound = 1.0 / jnp.sqrt(fan_in)
    w = jax.random.uniform(kw, (outc, inc, 3, 3), jnp.float32, -bound, bound)
    b = jax.random.uniform(kb, (outc,), jnp.float32, -bound, bound)
    gamma = jnp.ones((outc,), jnp.float32)
    beta = jnp.zeros((outc,), jnp.float32)
    return (w, b, gamma, beta)


if __name__ == "__main__":
    inc, outc = 4, 8
    N, H, W = 2, 16, 16

    root = jax.random.PRNGKey(0)
    k_x, k0, k1, k2 = jax.random.split(root, 4)
    params = {
        "conv": _init_conv(k0, inc, outc),   # ConvBlock(inc, outc, stride=2)
        "res1": _init_conv(k1, outc, outc),  # ResBlock.conv1
        "res2": _init_conv(k2, outc, outc),  # ResBlock.conv2
    }
    x = jax.random.normal(k_x, (N, inc, H, W), jnp.float32)

    fwd = jax.jit(conv_res_block_forward)
    out = jax.block_until_ready(fwd(x, params))
    ref = jax.block_until_ready(jax.jit(_ref_forward)(x, params))

    assert out.shape == (N, outc, H // 2, W // 2), out.shape
    assert jnp.allclose(out, ref, rtol=1e-4, atol=1e-4), float(jnp.max(jnp.abs(out - ref)))
    print("KERNEL_OK")
</pallas_src>

<mosaic_0001>
module attributes {stable_mosaic.version = 11 : i64} {
  func.func @_conv_mm_stats_kernel(%arg0: i32, %arg1: memref<64x36xf32, #tpu.memory_space<vmem>>, %arg2: memref<36x128xf32, #tpu.memory_space<vmem>>, %arg3: memref<1x128xf32, #tpu.memory_space<vmem>>, %arg4: memref<64x128xf32, #tpu.memory_space<vmem>>, %arg5: memref<1x1x128xf32, #tpu.memory_space<vmem>>, %arg6: memref<1x1x128xf32, #tpu.memory_space<vmem>>) attributes {dimension_semantics = [#tpu.dimension_semantics<parallel>], iteration_bounds = array<i64: 2>, scalar_prefetch = 0 : i64, scratch_operands = 0 : i64, tpu.core_type = #tpu.core_type<tc>, window_params = [{transform_indices = @transform_0, window_bounds = array<i64: 64, 36>}, {pipeline_mode = #tpu.pipeline_mode<synchronous>, transform_indices = @transform_1, window_bounds = array<i64: 36, 128>}, {pipeline_mode = #tpu.pipeline_mode<synchronous>, transform_indices = @transform_2, window_bounds = array<i64: 1, 128>}, {transform_indices = @transform_3, window_bounds = array<i64: 64, 128>}, {transform_indices = @transform_4, window_bounds = array<i64: 1, 1, 128>}, {transform_indices = @transform_5, window_bounds = array<i64: 1, 1, 128>}]} {
    %c0 = arith.constant 0 : index
    %c0_0 = arith.constant 0 : index
    %0 = vector.load %arg1[%c0, %c0_0] : memref<64x36xf32, #tpu.memory_space<vmem>>, vector<64x36xf32>
    %c0_1 = arith.constant 0 : index
    %c0_2 = arith.constant 0 : index
    %1 = vector.load %arg2[%c0_1, %c0_2] : memref<36x128xf32, #tpu.memory_space<vmem>>, vector<36x128xf32>
    %cst = arith.constant dense<0.000000e+00> : vector<64x128xf32>
    %2 = tpu.matmul %0, %1, %cst {dimension_numbers = #tpu.dot_dimension_numbers<[1], [0], [0], [1], [0, 0, 1, 1], [], []>} : vector<64x36xf32>, vector<36x128xf32>, vector<64x128xf32> -> vector<64x128xf32>
    %c0_3 = arith.constant 0 : index
    %c0_4 = arith.constant 0 : index
    %3 = vector.load %arg3[%c0_3, %c0_4] : memref<1x128xf32, #tpu.memory_space<vmem>>, vector<1x128xf32>
    %4 = vector.broadcast %3 : vector<1x128xf32> to vector<64x128xf32>
    %5 = arith.addf %2, %4 : vector<64x128xf32>
    %cst_5 = arith.constant 0.000000e+00 : f32
    %6 = vector.broadcast %cst_5 : f32 to vector<64x128xf32>
    %7 = arith.maximumf %5, %6 : vector<64x128xf32>
    %c0_6 = arith.constant 0 : index
    %c0_7 = arith.constant 0 : index
    %8 = vector.load %arg4[%c0_6, %c0_7] : memref<64x128xf32, #tpu.memory_space<vmem>>, vector<64x128xf32>
    tpu.vector_store %arg4[%c0_6, %c0_7], %7 {strides = array<i32>} : memref<64x128xf32, #tpu.memory_space<vmem>>, vector<64x128xf32>,
    %cst_8 = arith.constant dense<0.000000e+00> : vector<128xf32>
    %9 = vector.multi_reduction <add>, %7, %cst_8 [0] : vector<64x128xf32> to vector<128xf32>
    %10 = vector.shape_cast %9 : vector<128xf32> to vector<1x128xf32>
    %cst_9 = arith.constant 1.562500e-02 : f32
    %11 = vector.broadcast %cst_9 : f32 to vector<1x128xf32>
    %12 = arith.mulf %10, %11 : vector<1x128xf32>
    %13 = vector.broadcast %12 : vector<1x128xf32> to vector<64x128xf32>
    %14 = arith.subf %7, %13 : vector<64x128xf32>
    %15 = arith.mulf %14, %14 : vector<64x128xf32>
    %cst_10 = arith.constant dense<0.000000e+00> : vector<128xf32>
    %16 = vector.multi_reduction <add>, %15, %cst_10 [0] : vector<64x128xf32> to vector<128xf32>
    %17 = vector.shape_cast %16 : vector<128xf32> to vector<1x128xf32>
    %18 = vector.shape_cast %10 : vector<1x128xf32> to vector<1x1x128xf32>
    %c0_11 = arith.constant 0 : index
    %c0_12 = arith.constant 0 : index
    %c0_13 = arith.constant 0 : index
    %19 = vector.load %arg5[%c0_11, %c0_12, %c0_13] : memref<1x1x128xf32, #tpu.memory_space<vmem>>, vector<1x1x128xf32>
    tpu.vector_store %arg5[%c0_11, %c0_12, %c0_13], %18 {strides = array<i32>} : memref<1x1x128xf32, #tpu.memory_space<vmem>>, vector<1x1x128xf32>,
    %20 = vector.shape_cast %17 : vector<1x128xf32> to vector<1x1x128xf32>
    %c0_14 = arith.constant 0 : index
    %c0_15 = arith.constant 0 : index
    %c0_16 = arith.constant 0 : index
    %21 = vector.load %arg6[%c0_14, %c0_15, %c0_16] : memref<1x1x128xf32, #tpu.memory_space<vmem>>, vector<1x1x128xf32>
    tpu.vector_store %arg6[%c0_14, %c0_15, %c0_16], %20 {strides = array<i32>} : memref<1x1x128xf32, #tpu.memory_space<vmem>>, vector<1x1x128xf32>,
    return
  }
  func.func @transform_0(%arg0: i32) -> (i32, i32) {
    %c0_i32 = arith.constant 0 : i32
    %c0_i32_0 = arith.constant 0 : i32
    return %arg0, %c0_i32 : i32, i32
  }
  func.func @transform_1(%arg0: i32) -> (i32, i32) {
    %c0_i32 = arith.constant 0 : i32
    %c0_i32_0 = arith.constant 0 : i32
    %c0_i32_1 = arith.constant 0 : i32
    return %c0_i32, %c0_i32_0 : i32, i32
  }
  func.func @transform_2(%arg0: i32) -> (i32, i32) {
    %c0_i32 = arith.constant 0 : i32
    %c0_i32_0 = arith.constant 0 : i32
    %c0_i32_1 = arith.constant 0 : i32
    return %c0_i32, %c0_i32_0 : i32, i32
  }
  func.func @transform_3(%arg0: i32) -> (i32, i32) {
    %c0_i32 = arith.constant 0 : i32
    %c0_i32_0 = arith.constant 0 : i32
    return %arg0, %c0_i32 : i32, i32
  }
  func.func @transform_4(%arg0: i32) -> (i32, i32, i32) {
    %c0_i32 = arith.constant 0 : i32
    %c0_i32_0 = arith.constant 0 : i32
    %c0_i32_1 = arith.constant 0 : i32
    return %arg0, %c0_i32, %c0_i32_0 : i32, i32, i32
  }
  func.func @transform_5(%arg0: i32) -> (i32, i32, i32) {
    %c0_i32 = arith.constant 0 : i32
    %c0_i32_0 = arith.constant 0 : i32
    %c0_i32_1 = arith.constant 0 : i32
    return %arg0, %c0_i32, %c0_i32_0 : i32, i32, i32
  }
}

module attributes {stable_mosaic.version = 11 : i64} {
  func.func @_bn_apply_kernel(%arg0: i32, %arg1: memref<64x128xf32, #tpu.memory_space<vmem>>, %arg2: memref<1x128xf32, #tpu.memory_space<vmem>>, %arg3: memref<1x128xf32, #tpu.memory_space<vmem>>, %arg4: memref<64x128xf32, #tpu.memory_space<vmem>>) attributes {dimension_semantics = [#tpu.dimension_semantics<parallel>], iteration_bounds = array<i64: 2>, scalar_prefetch = 0 : i64, scratch_operands = 0 : i64, tpu.core_type = #tpu.core_type<tc>, window_params = [{transform_indices = @transform_0, window_bounds = array<i64: 64, 128>}, {pipeline_mode = #tpu.pipeline_mode<synchronous>, transform_indices = @transform_1, window_bounds = array<i64: 1, 128>}, {pipeline_mode = #tpu.pipeline_mode<synchronous>, transform_indices = @transform_2, window_bounds = array<i64: 1, 128>}, {transform_indices = @transform_3, window_bounds = array<i64: 64, 128>}]} {
    %c0 = arith.constant 0 : index
    %c0_0 = arith.constant 0 : index
    %0 = vector.load %arg1[%c0, %c0_0] : memref<64x128xf32, #tpu.memory_space<vmem>>, vector<64x128xf32>
    %c0_1 = arith.constant 0 : index
    %c0_2 = arith.constant 0 : index
    %1 = vector.load %arg2[%c0_1, %c0_2] : memref<1x128xf32, #tpu.memory_space<vmem>>, vector<1x128xf32>
    %2 = vector.broadcast %1 : vector<1x128xf32> to vector<64x128xf32>
    %3 = arith.mulf %0, %2 : vector<64x128xf32>
    %c0_3 = arith.constant 0 : index
    %c0_4 = arith.constant 0 : index
    %4 = vector.load %arg3[%c0_3, %c0_4] : memref<1x128xf32, #tpu.memory_space<vmem>>, vector<1x128xf32>
    %5 = vector.broadcast %4 : vector<1x128xf32> to vector<64x128xf32>
    %6 = arith.addf %3, %5 : vector<64x128xf32>
    %c0_5 = arith.constant 0 : index
    %c0_6 = arith.constant 0 : index
    %7 = vector.load %arg4[%c0_5, %c0_6] : memref<64x128xf32, #tpu.memory_space<vmem>>, vector<64x128xf32>
    tpu.vector_store %arg4[%c0_5, %c0_6], %6 {strides = array<i32>} : memref<64x128xf32, #tpu.memory_space<vmem>>, vector<64x128xf32>,
    return
  }
  func.func @transform_0(%arg0: i32) -> (i32, i32) {
    %c0_i32 = arith.constant 0 : i32
    %c0_i32_0 = arith.constant 0 : i32
    return %arg0, %c0_i32 : i32, i32
  }
  func.func @transform_1(%arg0: i32) -> (i32, i32) {
    %c0_i32 = arith.constant 0 : i32
    %c0_i32_0 = arith.constant 0 : i32
    %c0_i32_1 = arith.constant 0 : i32
    return %c0_i32, %c0_i32_0 : i32, i32
  }
  func.func @transform_2(%arg0: i32) -> (i32, i32) {
    %c0_i32 = arith.constant 0 : i32
    %c0_i32_0 = arith.constant 0 : i32
    %c0_i32_1 = arith.constant 0 : i32
    return %c0_i32, %c0_i32_0 : i32, i32
  }
  func.func @transform_3(%arg0: i32) -> (i32, i32) {
    %c0_i32 = arith.constant 0 : i32
    %c0_i32_0 = arith.constant 0 : i32
    return %arg0, %c0_i32 : i32, i32
  }
}

module attributes {stable_mosaic.version = 11 : i64} {
  func.func @_bn_apply_res_kernel(%arg0: i32, %arg1: memref<64x128xf32, #tpu.memory_space<vmem>>, %arg2: memref<1x128xf32, #tpu.memory_space<vmem>>, %arg3: memref<1x128xf32, #tpu.memory_space<vmem>>, %arg4: memref<64x128xf32, #tpu.memory_space<vmem>>, %arg5: memref<64x128xf32, #tpu.memory_space<vmem>>) attributes {dimension_semantics = [#tpu.dimension_semantics<parallel>], iteration_bounds = array<i64: 2>, scalar_prefetch = 0 : i64, scratch_operands = 0 : i64, tpu.core_type = #tpu.core_type<tc>, window_params = [{transform_indices = @transform_0, window_bounds = array<i64: 64, 128>}, {pipeline_mode = #tpu.pipeline_mode<synchronous>, transform_indices = @transform_1, window_bounds = array<i64: 1, 128>}, {pipeline_mode = #tpu.pipeline_mode<synchronous>, transform_indices = @transform_2, window_bounds = array<i64: 1, 128>}, {transform_indices = @transform_3, window_bounds = array<i64: 64, 128>}, {transform_indices = @transform_4, window_bounds = array<i64: 64, 128>}]} {
    %c0 = arith.constant 0 : index
    %c0_0 = arith.constant 0 : index
    %0 = vector.load %arg1[%c0, %c0_0] : memref<64x128xf32, #tpu.memory_space<vmem>>, vector<64x128xf32>
    %c0_1 = arith.constant 0 : index
    %c0_2 = arith.constant 0 : index
    %1 = vector.load %arg2[%c0_1, %c0_2] : memref<1x128xf32, #tpu.memory_space<vmem>>, vector<1x128xf32>
    %2 = vector.broadcast %1 : vector<1x128xf32> to vector<64x128xf32>
    %3 = arith.mulf %0, %2 : vector<64x128xf32>
    %c0_3 = arith.constant 0 : index
    %c0_4 = arith.constant 0 : index
    %4 = vector.load %arg3[%c0_3, %c0_4] : memref<1x128xf32, #tpu.memory_space<vmem>>, vector<1x128xf32>
    %5 = vector.broadcast %4 : vector<1x128xf32> to vector<64x128xf32>
    %6 = arith.addf %3, %5 : vector<64x128xf32>
    %c0_5 = arith.constant 0 : index
    %c0_6 = arith.constant 0 : index
    %7 = vector.load %arg4[%c0_5, %c0_6] : memref<64x128xf32, #tpu.memory_space<vmem>>, vector<64x128xf32>
    %8 = arith.addf %6, %7 : vector<64x128xf32>
    %c0_7 = arith.constant 0 : index
    %c0_8 = arith.constant 0 : index
    %9 = vector.load %arg5[%c0_7, %c0_8] : memref<64x128xf32, #tpu.memory_space<vmem>>, vector<64x128xf32>
    tpu.vector_store %arg5[%c0_7, %c0_8], %8 {strides = array<i32>} : memref<64x128xf32, #tpu.memory_space<vmem>>, vector<64x128xf32>,
    return
  }
  func.func @transform_0(%arg0: i32) -> (i32, i32) {
    %c0_i32 = arith.constant 0 : i32
    %c0_i32_0 = arith.constant 0 : i32
    return %arg0, %c0_i32 : i32, i32
  }
  func.func @transform_1(%arg0: i32) -> (i32, i32) {
    %c0_i32 = arith.constant 0 : i32
    %c0_i32_0 = arith.constant 0 : i32
    %c0_i32_1 = arith.constant 0 : i32
    return %c0_i32, %c0_i32_0 : i32, i32
  }
  func.func @transform_2(%arg0: i32) -> (i32, i32) {
    %c0_i32 = arith.constant 0 : i32
    %c0_i32_0 = arith.constant 0 : i32
    %c0_i32_1 = arith.constant 0 : i32
    return %c0_i32, %c0_i32_0 : i32, i32
  }
  func.func @transform_3(%arg0: i32) -> (i32, i32) {
    %c0_i32 = arith.constant 0 : i32
    %c0_i32_0 = arith.constant 0 : i32
    return %arg0, %c0_i32 : i32, i32
  }
  func.func @transform_4(%arg0: i32) -> (i32, i32) {
    %c0_i32 = arith.constant 0 : i32
    %c0_i32_0 = arith.constant 0 : i32
    return %arg0, %c0_i32 : i32, i32
  }
}

module attributes {stable_mosaic.version = 11 : i64} {
  func.func @_conv_mm_stats_kernel(%arg0: i32, %arg1: memref<64x72xf32, #tpu.memory_space<vmem>>, %arg2: memref<72x128xf32, #tpu.memory_space<vmem>>, %arg3: memref<1x128xf32, #tpu.memory_space<vmem>>, %arg4: memref<64x128xf32, #tpu.memory_space<vmem>>, %arg5: memref<1x1x128xf32, #tpu.memory_space<vmem>>, %arg6: memref<1x1x128xf32, #tpu.memory_space<vmem>>) attributes {dimension_semantics = [#tpu.dimension_semantics<parallel>], iteration_bounds = array<i64: 2>, scalar_prefetch = 0 : i64, scratch_operands = 0 : i64, tpu.core_type = #tpu.core_type<tc>, window_params = [{transform_indices = @transform_0, window_bounds = array<i64: 64, 72>}, {pipeline_mode = #tpu.pipeline_mode<synchronous>, transform_indices = @transform_1, window_bounds = array<i64: 72, 128>}, {pipeline_mode = #tpu.pipeline_mode<synchronous>, transform_indices = @transform_2, window_bounds = array<i64: 1, 128>}, {transform_indices = @transform_3, window_bounds = array<i64: 64, 128>}, {transform_indices = @transform_4, window_bounds = array<i64: 1, 1, 128>}, {transform_indices = @transform_5, window_bounds = array<i64: 1, 1, 128>}]} {
    %c0 = arith.constant 0 : index
    %c0_0 = arith.constant 0 : index
    %0 = vector.load %arg1[%c0, %c0_0] : memref<64x72xf32, #tpu.memory_space<vmem>>, vector<64x72xf32>
    %c0_1 = arith.constant 0 : index
    %c0_2 = arith.constant 0 : index
    %1 = vector.load %arg2[%c0_1, %c0_2] : memref<72x128xf32, #tpu.memory_space<vmem>>, vector<72x128xf32>
    %cst = arith.constant dense<0.000000e+00> : vector<64x128xf32>
    %2 = tpu.matmul %0, %1, %cst {dimension_numbers = #tpu.dot_dimension_numbers<[1], [0], [0], [1], [0, 0, 1, 1], [], []>} : vector<64x72xf32>, vector<72x128xf32>, vector<64x128xf32> -> vector<64x128xf32>
    %c0_3 = arith.constant 0 : index
    %c0_4 = arith.constant 0 : index
    %3 = vector.load %arg3[%c0_3, %c0_4] : memref<1x128xf32, #tpu.memory_space<vmem>>, vector<1x128xf32>
    %4 = vector.broadcast %3 : vector<1x128xf32> to vector<64x128xf32>
    %5 = arith.addf %2, %4 : vector<64x128xf32>
    %cst_5 = arith.constant 0.000000e+00 : f32
    %6 = vector.broadcast %cst_5 : f32 to vector<64x128xf32>
    %7 = arith.maximumf %5, %6 : vector<64x128xf32>
    %c0_6 = arith.constant 0 : index
    %c0_7 = arith.constant 0 : index
    %8 = vector.load %arg4[%c0_6, %c0_7] : memref<64x128xf32, #tpu.memory_space<vmem>>, vector<64x128xf32>
    tpu.vector_store %arg4[%c0_6, %c0_7], %7 {strides = array<i32>} : memref<64x128xf32, #tpu.memory_space<vmem>>, vector<64x128xf32>,
    %cst_8 = arith.constant dense<0.000000e+00> : vector<128xf32>
    %9 = vector.multi_reduction <add>, %7, %cst_8 [0] : vector<64x128xf32> to vector<128xf32>
    %10 = vector.shape_cast %9 : vector<128xf32> to vector<1x128xf32>
    %cst_9 = arith.constant 1.562500e-02 : f32
    %11 = vector.broadcast %cst_9 : f32 to vector<1x128xf32>
    %12 = arith.mulf %10, %11 : vector<1x128xf32>
    %13 = vector.broadcast %12 : vector<1x128xf32> to vector<64x128xf32>
    %14 = arith.subf %7, %13 : vector<64x128xf32>
    %15 = arith.mulf %14, %14 : vector<64x128xf32>
    %cst_10 = arith.constant dense<0.000000e+00> : vector<128xf32>
    %16 = vector.multi_reduction <add>, %15, %cst_10 [0] : vector<64x128xf32> to vector<128xf32>
    %17 = vector.shape_cast %16 : vector<128xf32> to vector<1x128xf32>
    %18 = vector.shape_cast %10 : vector<1x128xf32> to vector<1x1x128xf32>
    %c0_11 = arith.constant 0 : index
    %c0_12 = arith.constant 0 : index
    %c0_13 = arith.constant 0 : index
    %19 = vector.load %arg5[%c0_11, %c0_12, %c0_13] : memref<1x1x128xf32, #tpu.memory_space<vmem>>, vector<1x1x128xf32>
    tpu.vector_store %arg5[%c0_11, %c0_12, %c0_13], %18 {strides = array<i32>} : memref<1x1x128xf32, #tpu.memory_space<vmem>>, vector<1x1x128xf32>,
    %20 = vector.shape_cast %17 : vector<1x128xf32> to vector<1x1x128xf32>
    %c0_14 = arith.constant 0 : index
    %c0_15 = arith.constant 0 : index
    %c0_16 = arith.constant 0 : index
    %21 = vector.load %arg6[%c0_14, %c0_15, %c0_16] : memref<1x1x128xf32, #tpu.memory_space<vmem>>, vector<1x1x128xf32>
    tpu.vector_store %arg6[%c0_14, %c0_15, %c0_16], %20 {strides = array<i32>} : memref<1x1x128xf32, #tpu.memory_space<vmem>>, vector<1x1x128xf32>,
    return
  }
  func.func @transform_0(%arg0: i32) -> (i32, i32) {
    %c0_i32 = arith.constant 0 : i32
    %c0_i32_0 = arith.constant 0 : i32
    return %arg0, %c0_i32 : i32, i32
  }
  func.func @transform_1(%arg0: i32) -> (i32, i32) {
    %c0_i32 = arith.constant 0 : i32
    %c0_i32_0 = arith.constant 0 : i32
    %c0_i32_1 = arith.constant 0 : i32
    return %c0_i32, %c0_i32_0 : i32, i32
  }
  func.func @transform_2(%arg0: i32) -> (i32, i32) {
    %c0_i32 = arith.constant 0 : i32
    %c0_i32_0 = arith.constant 0 : i32
    %c0_i32_1 = arith.constant 0 : i32
    return %c0_i32, %c0_i32_0 : i32, i32
  }
  func.func @transform_3(%arg0: i32) -> (i32, i32) {
    %c0_i32 = arith.constant 0 : i32
    %c0_i32_0 = arith.constant 0 : i32
    return %arg0, %c0_i32 : i32, i32
  }
  func.func @transform_4(%arg0: i32) -> (i32, i32, i32) {
    %c0_i32 = arith.constant 0 : i32
    %c0_i32_0 = arith.constant 0 : i32
    %c0_i32_1 = arith.constant 0 : i32
    return %arg0, %c0_i32, %c0_i32_0 : i32, i32, i32
  }
  func.func @transform_5(%arg0: i32) -> (i32, i32, i32) {
    %c0_i32 = arith.constant 0 : i32
    %c0_i32_0 = arith.constant 0 : i32
    %c0_i32_1 = arith.constant 0 : i32
    return %arg0, %c0_i32, %c0_i32_0 : i32, i32, i32
  }
}

</mosaic_0001>

<bundles_post_ra>
// kernel: conv_res_block_forward.6
= control target key start
LH: loop header
LB: loop body
LE: loop exit
PB: predicated region body
PF: predicated region fallthrough
CT: control target
= control target key end

     0   :  { %s678_s18 = smov 0   ;;  %s753_s0 = inlined_call_operand.vmem [shape: f32[128,36], index: 0, kind: input, shape index: {}]   ;;  %s754_s1 = inlined_call_operand.vmem [shape: f32[36,128], index: 1, kind: input, shape index: {}]   ;;  %s755_s2 = inlined_call_operand.vmem [shape: f32[1,128], index: 2, kind: input, shape index: {}]   ;;  %s756_s3 = inlined_call_operand.vmem [shape: f32[128,128], index: 3, kind: output, shape index: {0}]   ;;  %s757_s4 = inlined_call_operand.vmem [shape: f32[2,1,128], index: 4, kind: output, shape index: {1}]   ;;  %s758_s5 = inlined_call_operand.vmem [shape: f32[2,1,128], index: 5, kind: output, shape index: {2}]  }
   0x1 LB: > { %s684_s19 = sadd.s32 4294967295, %s646_s18   ;;  %p570_p0 = scmp.ge.s32.totalorder %s646_s18, 1  ;;  %s646_s18 = sphi %s678_s18, %s16_s18  }
   0x2   : > { %p193_p1 = scmp.lt.s32.totalorder %s646_s18, 3 }
   0x4   : > { %p194_p2 = pnand %p570_p0, %p193_p1 }
   0x5   : > { %s571_s24 = sshll.u32 (!%p194_p2), %s684_s19, 3  ;;  %p239_p4 = scmp.lt.s32.totalorder (!%p194_p2), %s684_s19, 1 }
   0x6   : > { %197 = sbr.rel (%p194_p2) target bundleno = 282 (0x11a), region = 32  ;;  %p228_p3 = scmp.lt.s32.totalorder (!%p194_p2), %s571_s24, 15 }
   0xb   : > { %v257_v0 = vld [vmem:[%s754_s1 + $0x20] sm:$0xf]  ;;  %vm290_vm0 = vcmask 1043456   ;;  %v256_v1 = vld [vmem:[%s754_s1 + $0x18] sm:$0xff]  ;;  %v255_v2 = vld [vmem:[%s754_s1 + $0x10] sm:$0xff]  ;;  %s760_s24 = smov (!%p228_p3, %s571_s24), 15 }
   0xc   : > { %600 = vmatprep.subr.msk.mxu0 %vm290_vm0, %v257_v0  ;;  %622 = vmatprep.subr.msk.mxu1 %vm290_vm0, %v257_v0  ;;  %v254_v3 = vld [vmem:[%s754_s1 + $0x8] sm:$0xff]  ;;  %s572_s29 = sshll.u32 %s760_s24, 3  ;;  %vm265_vm1 = vcmask 293888   ;;  %v253_v4 = vld [vmem:[%s754_s1] sm:$0xff]  ;;  %s762_s19 = smov (!%p239_p4, %s684_s19), 1 }
   0xd   : > { %601 = vmatpush3.msk.msra.mxu0 %vm290_vm0, %v257_v0  ;;  %627 = vmatpush3.msk.msra.mxu1 %vm290_vm0, %v257_v0  ;;  %s231_s9 = scalar_lea.vmem %s753_s0, %s572_s29  ;;  %v575_v13 = vld [vmem:[%s755_s2] ss:$0 sm:$0xff]  ;;  %s728_s14 = scalar_lea.vmem %s756_s3, %s572_s29 }
   0xe   : > { %602 = vmatprep.subr.mxu0 %v256_v1  ;;  %623 = vmatprep.subr.mxu1 %v256_v1  ;;  %v245_v5 = vld [vmem:[%s231_s9] sm:$0xff]  ;;  %v246_v6 = vld [vmem:[%s231_s9 + $0x8] sm:$0xff]  ;;  %v247_v7 = vld [vmem:[%s231_s9 + $0x10] sm:$0xff]  ;;  %s241_s17 = scalar_lea.vmem %s757_s4, %s762_s19  ;;  %s244_s22 = scalar_lea.vmem %s758_s5, %s762_s19 }
   0xf   : > { %603 = vmatpush3.msra.mxu0 %v256_v1  ;;  %628 = vmatpush3.msra.mxu1 %v256_v1  ;;  %v249_v8 = vld [vmem:[%s231_s9 + $0x20] sm:$0xff]  ;;  %v250_v9 = vld [vmem:[%s231_s9 + $0x28] sm:$0xff]  ;;  %v251_v10 = vld [vmem:[%s231_s9 + $0x30] sm:$0xff] }
  0x10   : > { %604 = vmatprep.subr.mxu0 %v255_v2  ;;  %624 = vmatprep.subr.mxu1 %v255_v2  ;;  %v248_v11 = vld [vmem:[%s231_s9 + $0x18] sm:$0xff] }
  0x11   : > { %605 = vmatpush3.msra.mxu0 %v255_v2  ;;  %629 = vmatpush3.msra.mxu1 %v255_v2  ;;  %v252_v12 = vld [vmem:[%s231_s9 + $0x38] sm:$0xff] }
  0x12   : > { %606 = vmatprep.subr.mxu0 %v254_v3  ;;  %625 = vmatprep.subr.mxu1 %v254_v3 }
  0x13   : > { %607 = vmatpush3.msra.mxu0 %v254_v3  ;;  %610 = vmatprep.mubr.msk.f32.mxu0 %vm265_vm1, %v245_v5 }
  0x14   : > { %608 = vmatprep.subr.mxu0 %v253_v4  ;;  %630 = vmatpush3.msra.mxu1 %v254_v3 }
  0x15   : > { %609 = vmatpush3.msra.mxu0 %v253_v4  ;;  %626 = vmatprep.subr.mxu1 %v253_v4 }
  0x16   : > { %611 = vmatmul.mubr.msk.f32.vlgmr.msra.gmra.mxu0 %vm265_vm1, %v246_v6  ;;  %631 = vmatpush3.msra.mxu1 %v253_v4 }
  0x17   : > { %613 = vmatprep.mubr.msk.f32.mxu0 %vm265_vm1, %v247_v7  ;;  %616 = vmatprep.mubr.msk.f32.mxu1 %vm265_vm1, %v249_v8 }
  0x18   : > { %617 = vmatmul.mubr.msk.f32.vlgmr.msra.gmra.mxu1 %vm265_vm1, %v250_v9 }
  0x19   : > { %619 = vmatprep.mubr.msk.f32.mxu1 %vm265_vm1, %v251_v10 }
  0x1a   : > { %614 = vmatmul.mubr.msk.f32.gmra.mxu0 %vm265_vm1, %v248_v11 }
  0x1c   : > { %620 = vmatmul.mubr.msk.f32.gmra.mxu1 %vm265_vm1, %v252_v12 }
  0xd6   : > { %v612_v14 = vpop.f32.mrf.mxu0 }
  0xd7   : > { %v366_v15 = vadd.f32 %v612_v14, %v575_v13 }
  0xd8   : > { %v360_v16 = vpop.f32.mrf.mxu0  ;;  %v618_v17 = vpop.f32.mrf.mxu1 }
  0xd9   : > { %v400_v18 = vmax.f32 %v366_v15, 0.0  ;;  %v361_v19 = vadd.f32 %v575_v13, %v360_v16  ;;  %v386_v20 = vadd.f32 %v618_v17, %v575_v13 }
  0xda   : > { %v615_v21 = vpop.f32.mrf.mxu0  ;;  %v380_v22 = vpop.f32.mrf.mxu1 }
  0xdb   : > { %408 = vst [vmem:[%s728_s14 + $0x8] sm:$0xff] %v400_v18  ;;  %v399_v23 = vmax.f32 %v361_v19, 0.0  ;;  %v376_v24 = vadd.f32 %v615_v21, %v575_v13  ;;  %v404_v25 = vmax.f32 %v386_v20, 0.0  ;;  %v381_v26 = vadd.f32 %v575_v13, %v380_v22 }
  0xdc   : > { %v370_v27 = vpop.f32.mrf.mxu0  ;;  %v621_v28 = vpop.f32.mrf.mxu1 }
  0xdd   : > { %407 = vst [vmem:[%s728_s14] sm:$0xff] %v399_v23  ;;  %v402_v29 = vmax.f32 %v376_v24, 0.0  ;;  %v371_v30 = vadd.f32 %v575_v13, %v370_v27  ;;  %412 = vst [vmem:[%s728_s14 + $0x28] sm:$0xff] %v404_v25  ;;  %v403_v31 = vmax.f32 %v381_v26, 0.0  ;;  %v396_v32 = vadd.f32 %v621_v28, %v575_v13 }
  0xde   : > { %v390_v33 = vpop.f32.mrf.mxu1  ;;  %v415_v34 = vadd.f32 %v400_v18, %v399_v23 }
  0xdf   : > { %410 = vst [vmem:[%s728_s14 + $0x18] sm:$0xff] %v402_v29  ;;  %v401_v35 = vmax.f32 %v371_v30, 0.0  ;;  %411 = vst [vmem:[%s728_s14 + $0x20] sm:$0xff] %v403_v31  ;;  %v391_v36 = vadd.f32 %v575_v13, %v390_v33  ;;  %v406_v37 = vmax.f32 %v396_v32, 0.0 }
  0xe1   : > { %409 = vst [vmem:[%s728_s14 + $0x10] sm:$0xff] %v401_v35  ;;  %v416_v38 = vadd.f32 %v415_v34, %v401_v35  ;;  %v405_v39 = vmax.f32 %v391_v36, 0.0  ;;  %414 = vst [vmem:[%s728_s14 + $0x38] sm:$0xff] %v406_v37 }
  0xe3   : > { %v417_v40 = vadd.f32 %v416_v38, %v402_v29  ;;  %413 = vst [vmem:[%s728_s14 + $0x30] sm:$0xff] %v405_v39 }
  0xe5   : > { %v418_v41 = vadd.f32 %v417_v40, %v403_v31 }
  0xe7   : > { %v419_v42 = vadd.f32 %v418_v41, %v404_v25 }
  0xe9   : > { %v420_v43 = vadd.f32 %v419_v42, %v405_v39 }
  0xeb   : > { %v421_v44 = vadd.f32 %v420_v43, %v406_v37 }
  0xed   : > { %v422_v45 = vrot.slane %v421_v44, 4 }
  0xef   : > { %v423_v46 = vadd.f32 %v422_v45, %v421_v44 }
  0xf1   : > { %v424_v47 = vrot.slane %v423_v46, 2 }
  0xf3   : > { %v425_v48 = vadd.f32 %v424_v47, %v423_v46 }
  0xf5   : > { %v426_v49 = vrot.slane %v425_v48, 1 }
  0xf7   : > { %v427_v50 = vadd.f32 %v426_v49, %v425_v48 }
  0xf9   : > { %v428_v51 = vmul.f32 0.015625, %v427_v50  ;;  %458 = vst [vmem:[%s241_s17] sm:$0x1] %v427_v50 }
  0xfb   : > { %v429_v52 = vsub.f32 %v399_v23, %v428_v51  ;;  %v430_v53 = vsub.f32 %v400_v18, %v428_v51  ;;  %v431_v54 = vsub.f32 %v401_v35, %v428_v51  ;;  %v432_v55 = vsub.f32 %v402_v29, %v428_v51 }
  0xfc   : > { %v433_v58 = vsub.f32 %v403_v31, %v428_v51  ;;  %v434_v61 = vsub.f32 %v404_v25, %v428_v51  ;;  %v435_v0 = vsub.f32 %v405_v39, %v428_v51  ;;  %v436_v3 = vsub.f32 %v406_v37, %v428_v51 }
  0xfd   : > { %v437_v56 = vmul.f32 %v429_v52, %v429_v52  ;;  %v438_v57 = vmul.f32 %v430_v53, %v430_v53  ;;  %v439_v59 = vmul.f32 %v431_v54, %v431_v54  ;;  %v440_v62 = vmul.f32 %v432_v55, %v432_v55 }
  0xfe   : > { %v441_v1 = vmul.f32 %v433_v58, %v433_v58  ;;  %v442_v4 = vmul.f32 %v434_v61, %v434_v61  ;;  %v443_v6 = vmul.f32 %v435_v0, %v435_v0  ;;  %v444_v8 = vmul.f32 %v436_v3, %v436_v3 }
  0xff   : > { %v445_v60 = vadd.f32 %v438_v57, %v437_v56 }
 0x101   : > { %v446_v63 = vadd.f32 %v445_v60, %v439_v59 }
 0x103   : > { %v447_v2 = vadd.f32 %v446_v63, %v440_v62 }
 0x105   : > { %v448_v5 = vadd.f32 %v447_v2, %v441_v1 }
 0x107   : > { %v449_v7 = vadd.f32 %v448_v5, %v442_v4 }
 0x109   : > { %v450_v9 = vadd.f32 %v449_v7, %v443_v6 }
 0x10b   : > { %v451_v10 = vadd.f32 %v450_v9, %v444_v8 }
 0x10d   : > { %v452_v11 = vrot.slane %v451_v10, 4 }
 0x10f   : > { %v453_v12 = vadd.f32 %v452_v11, %v451_v10 }
 0x111   : > { %v454_v13 = vrot.slane %v453_v12, 2 }
 0x113   : > { %v455_v14 = vadd.f32 %v454_v13, %v453_v12 }
 0x115   : > { %v456_v15 = vrot.slane %v455_v14, 1 }
 0x117   : > { %v457_v16 = vadd.f32 %v456_v15, %v455_v14 }
 0x119   : > { %459 = vst [vmem:[%s244_s22] sm:$0x1] %v457_v16 }
 0x11a PF: > { %s16_s18 = sadd.s32 1, %s646_s18  }
 0x11b   : > { %p13_p5 = scmp.ge.s32.totalorder %s16_s18, 4  }
 0x11d   :  { %15 = sbr.rel (!%p13_p5) target bundleno = 1 (0x1), region = 86 }

// kernel: conv_res_block_forward.7
= control target key start
LH: loop header
LB: loop body
LE: loop exit
PB: predicated region body
PF: predicated region fallthrough
CT: control target
= control target key end

     0   :  { %s325_s12 = smov 0   ;;  %s348_s0 = inlined_call_operand.vmem [shape: f32[128,128], index: 0, kind: input, shape index: {}]   ;;  %s349_s1 = inlined_call_operand.vmem [shape: f32[1,128], index: 1, kind: input, shape index: {}]   ;;  %s350_s2 = inlined_call_operand.vmem [shape: f32[1,128], index: 2, kind: input, shape index: {}]   ;;  %s351_s3 = inlined_call_operand.vmem [shape: f32[128,128], index: 3, kind: output, shape index: {}]  }
   0x1 LB: > { %s276_s13 = sadd.s32 4294967295, %s303_s12   ;;  %p280_p0 = scmp.ge.s32.totalorder %s303_s12, 1  ;;  %s303_s12 = sphi %s325_s12, %s13_s12  }
   0x2   : > { %p138_p1 = scmp.lt.s32.totalorder %s303_s12, 3 }
   0x4   : > { %p139_p2 = pnand %p280_p0, %p138_p1 }
   0x5   : > { %s281_s14 = sshll.u32 (!%p139_p2), %s276_s13, 3 }
   0x6   : > { %142 = sbr.rel (%p139_p2) target bundleno = 23 (0x17), region = 32  ;;  %p163_p3 = scmp.lt.s32.totalorder (!%p139_p2), %s281_s14, 15 }
   0xb   : > { %s353_s14 = smov (!%p163_p3, %s281_s14), 15  ;;  %v285_v0 = vld [vmem:[%s349_s1] ss:$0 sm:$0xff] }
   0xc   : > { %s282_s15 = sshll.u32 %s353_s14, 3  ;;  %v286_v1 = vld [vmem:[%s350_s2] ss:$0 sm:$0xff] }
   0xd   : > { %s166_s20 = scalar_lea.vmem %s348_s0, %s282_s15  ;;  %s172_s25 = scalar_lea.vmem %s351_s3, %s282_s15 }
   0xe   : > { %v174_v2 = vld [vmem:[%s166_s20] sm:$0xff]  ;;  %v175_v3 = vld [vmem:[%s166_s20 + $0x8] sm:$0xff]  ;;  %v176_v4 = vld [vmem:[%s166_s20 + $0x10] sm:$0xff] }
   0xf   : > { %v189_v5 = vmul.f32 %v285_v0, %v174_v2  ;;  %v190_v6 = vmul.f32 %v285_v0, %v175_v3  ;;  %v191_v7 = vmul.f32 %v285_v0, %v176_v4  ;;  %v177_v8 = vld [vmem:[%s166_s20 + $0x18] sm:$0xff]  ;;  %v178_v9 = vld [vmem:[%s166_s20 + $0x20] sm:$0xff]  ;;  %v179_v10 = vld [vmem:[%s166_s20 + $0x28] sm:$0xff] }
  0x10   : > { %v192_v11 = vmul.f32 %v285_v0, %v177_v8  ;;  %v193_v12 = vmul.f32 %v285_v0, %v178_v9  ;;  %v194_v13 = vmul.f32 %v285_v0, %v179_v10  ;;  %v180_v14 = vld [vmem:[%s166_s20 + $0x30] sm:$0xff]  ;;  %v181_v15 = vld [vmem:[%s166_s20 + $0x38] sm:$0xff] }
  0x11   : > { %v204_v16 = vadd.f32 %v286_v1, %v189_v5  ;;  %v205_v17 = vadd.f32 %v286_v1, %v190_v6  ;;  %v206_v18 = vadd.f32 %v286_v1, %v191_v7  ;;  %v195_v19 = vmul.f32 %v285_v0, %v180_v14 }
  0x12   : > { %v207_v20 = vadd.f32 %v286_v1, %v192_v11  ;;  %v208_v21 = vadd.f32 %v286_v1, %v193_v12  ;;  %v209_v22 = vadd.f32 %v286_v1, %v194_v13  ;;  %v196_v23 = vmul.f32 %v285_v0, %v181_v15 }
  0x13   : > { %212 = vst [vmem:[%s172_s25] sm:$0xff] %v204_v16  ;;  %213 = vst [vmem:[%s172_s25 + $0x8] sm:$0xff] %v205_v17  ;;  %v210_v24 = vadd.f32 %v286_v1, %v195_v19 }
  0x14   : > { %214 = vst [vmem:[%s172_s25 + $0x10] sm:$0xff] %v206_v18  ;;  %215 = vst [vmem:[%s172_s25 + $0x18] sm:$0xff] %v207_v20  ;;  %v211_v25 = vadd.f32 %v286_v1, %v196_v23 }
  0x15   : > { %216 = vst [vmem:[%s172_s25 + $0x20] sm:$0xff] %v208_v21  ;;  %217 = vst [vmem:[%s172_s25 + $0x28] sm:$0xff] %v209_v22 }
  0x16   : > { %218 = vst [vmem:[%s172_s25 + $0x30] sm:$0xff] %v210_v24  ;;  %219 = vst [vmem:[%s172_s25 + $0x38] sm:$0xff] %v211_v25 }
  0x17 PF: > { %s13_s12 = sadd.s32 1, %s303_s12  }
  0x18   : > { %p10_p4 = scmp.ge.s32.totalorder %s13_s12, 4  }
  0x1a   :  { %12 = sbr.rel (!%p10_p4) target bundleno = 1 (0x1), region = 62 }

// kernel: conv_res_block_forward.11
= control target key start
LH: loop header
LB: loop body
LE: loop exit
PB: predicated region body
PF: predicated region fallthrough
CT: control target
= control target key end

     0   :  { %s409_s15 = smov 0   ;;  %s455_s0 = inlined_call_operand.vmem [shape: f32[128,128], index: 0, kind: input, shape index: {}]   ;;  %s456_s1 = inlined_call_operand.vmem [shape: f32[1,128], index: 1, kind: input, shape index: {}]   ;;  %s457_s2 = inlined_call_operand.vmem [shape: f32[1,128], index: 2, kind: input, shape index: {}]   ;;  %s458_s3 = inlined_call_operand.vmem [shape: f32[128,128], index: 3, kind: input, shape index: {}]   ;;  %s459_s4 = inlined_call_operand.vmem [shape: f32[128,128], index: 4, kind: output, shape index: {}]  }
   0x1 LB: > { %s353_s16 = sadd.s32 4294967295, %s382_s15   ;;  %p357_p0 = scmp.ge.s32.totalorder %s382_s15, 1  ;;  %s382_s15 = sphi %s409_s15, %s14_s15  }
   0x2   : > { %p174_p1 = scmp.lt.s32.totalorder %s382_s15, 3 }
   0x4   : > { %p175_p2 = pnand %p357_p0, %p174_p1 }
   0x5   : > { %s358_s17 = sshll.u32 (!%p175_p2), %s353_s16, 3 }
   0x6   : > { %178 = sbr.rel (%p175_p2) target bundleno = 27 (0x1b), region = 36  ;;  %p206_p3 = scmp.lt.s32.totalorder (!%p175_p2), %s358_s17, 15 }
   0xb   : > { %s461_s17 = smov (!%p206_p3, %s358_s17), 15  ;;  %v364_v0 = vld [vmem:[%s456_s1] ss:$0 sm:$0xff] }
   0xc   : > { %s359_s18 = sshll.u32 %s461_s17, 3  ;;  %v365_v2 = vld [vmem:[%s457_s2] ss:$0 sm:$0xff] }
   0xd   : > { %s209_s23 = scalar_lea.vmem %s455_s0, %s359_s18  ;;  %s426_s26 = scalar_lea.vmem %s458_s3, %s359_s18 }
   0xe   : > { %v223_v1 = vld [vmem:[%s209_s23] sm:$0xff]  ;;  %v224_v3 = vld [vmem:[%s209_s23 + $0x8] sm:$0xff]  ;;  %v225_v7 = vld [vmem:[%s209_s23 + $0x10] sm:$0xff]  ;;  %s438_s5 = scalar_lea.vmem %s459_s4, %s359_s18 }
   0xf   : > { %v238_v4 = vmul.f32 %v364_v0, %v223_v1  ;;  %v261_v5 = vld [vmem:[%s426_s26] sm:$0xff]  ;;  %v239_v6 = vmul.f32 %v364_v0, %v224_v3  ;;  %v262_v8 = vld [vmem:[%s426_s26 + $0x8] sm:$0xff]  ;;  %v240_v9 = vmul.f32 %v364_v0, %v225_v7  ;;  %v226_v10 = vld [vmem:[%s209_s23 + $0x18] sm:$0xff] }
  0x10   : > { %v227_v11 = vld [vmem:[%s209_s23 + $0x20] sm:$0xff]  ;;  %v263_v14 = vld [vmem:[%s426_s26 + $0x10] sm:$0xff]  ;;  %v241_v15 = vmul.f32 %v364_v0, %v226_v10  ;;  %v264_v16 = vld [vmem:[%s426_s26 + $0x18] sm:$0xff] }
  0x11   : > { %v253_v12 = vadd.f32 %v365_v2, %v238_v4  ;;  %v254_v13 = vadd.f32 %v365_v2, %v239_v6  ;;  %v242_v17 = vmul.f32 %v364_v0, %v227_v11  ;;  %v228_v18 = vld [vmem:[%s209_s23 + $0x28] sm:$0xff]  ;;  %v255_v19 = vadd.f32 %v365_v2, %v240_v9  ;;  %v265_v20 = vld [vmem:[%s426_s26 + $0x20] sm:$0xff]  ;;  %v229_v22 = vld [vmem:[%s209_s23 + $0x30] sm:$0xff] }
  0x12   : > { %v243_v21 = vmul.f32 %v364_v0, %v228_v18  ;;  %v230_v23 = vld [vmem:[%s209_s23 + $0x38] sm:$0xff]  ;;  %v256_v26 = vadd.f32 %v365_v2, %v241_v15  ;;  %v266_v28 = vld [vmem:[%s426_s26 + $0x28] sm:$0xff]  ;;  %v244_v31 = vmul.f32 %v364_v0, %v229_v22  ;;  %v267_v35 = vld [vmem:[%s426_s26 + $0x30] sm:$0xff] }
  0x13   : > { %v269_v24 = vadd.f32 %v261_v5, %v253_v12  ;;  %v270_v25 = vadd.f32 %v262_v8, %v254_v13  ;;  %v257_v27 = vadd.f32 %v365_v2, %v242_v17  ;;  %v271_v29 = vadd.f32 %v263_v14, %v255_v19  ;;  %v268_v36 = vld [vmem:[%s426_s26 + $0x38] sm:$0xff] }
  0x14   : > { %v258_v30 = vadd.f32 %v365_v2, %v243_v21  ;;  %v245_v32 = vmul.f32 %v364_v0, %v230_v23  ;;  %v272_v33 = vadd.f32 %v264_v16, %v256_v26  ;;  %v259_v38 = vadd.f32 %v365_v2, %v244_v31 }
  0x15   : > { %277 = vst [vmem:[%s438_s5] sm:$0xff] %v269_v24  ;;  %278 = vst [vmem:[%s438_s5 + $0x8] sm:$0xff] %v270_v25  ;;  %v273_v34 = vadd.f32 %v265_v20, %v257_v27 }
  0x16   : > { %279 = vst [vmem:[%s438_s5 + $0x10] sm:$0xff] %v271_v29  ;;  %v274_v37 = vadd.f32 %v266_v28, %v258_v30  ;;  %v260_v39 = vadd.f32 %v365_v2, %v245_v32  ;;  %280 = vst [vmem:[%s438_s5 + $0x18] sm:$0xff] %v272_v33  ;;  %v275_v40 = vadd.f32 %v267_v35, %v259_v38 }
  0x17   : > { %281 = vst [vmem:[%s438_s5 + $0x20] sm:$0xff] %v273_v34 }
  0x18   : > { %282 = vst [vmem:[%s438_s5 + $0x28] sm:$0xff] %v274_v37  ;;  %v276_v41 = vadd.f32 %v268_v36, %v260_v39  ;;  %283 = vst [vmem:[%s438_s5 + $0x30] sm:$0xff] %v275_v40 }
  0x1a   : > { %284 = vst [vmem:[%s438_s5 + $0x38] sm:$0xff] %v276_v41 }
  0x1b PF: > { %s14_s15 = sadd.s32 1, %s382_s15  }
  0x1c   : > { %p11_p4 = scmp.ge.s32.totalorder %s14_s15, 4  }
  0x1e   :  { %13 = sbr.rel (!%p11_p4) target bundleno = 1 (0x1), region = 69 }

// kernel: conv_res_block_forward.8
= control target key start
LH: loop header
LB: loop body
LE: loop exit
PB: predicated region body
PF: predicated region fallthrough
CT: control target
= control target key end

     0   :  { %s697_s18 = smov 0   ;;  %s794_s0 = inlined_call_operand.vmem [shape: f32[128,72], index: 0, kind: input, shape index: {}]   ;;  %s795_s1 = inlined_call_operand.vmem [shape: f32[72,128], index: 1, kind: input, shape index: {}]   ;;  %s796_s2 = inlined_call_operand.vmem [shape: f32[1,128], index: 2, kind: input, shape index: {}]   ;;  %s797_s3 = inlined_call_operand.vmem [shape: f32[128,128], index: 3, kind: output, shape index: {0}]   ;;  %s798_s4 = inlined_call_operand.vmem [shape: f32[2,1,128], index: 4, kind: output, shape index: {1}]   ;;  %s799_s5 = inlined_call_operand.vmem [shape: f32[2,1,128], index: 5, kind: output, shape index: {2}]  }
   0x1 LB: > { %s703_s19 = sadd.s32 4294967295, %s665_s18   ;;  %p570_p0 = scmp.ge.s32.totalorder %s665_s18, 1  ;;  %s665_s18 = sphi %s697_s18, %s16_s18  }
   0x2   : > { %p193_p1 = scmp.lt.s32.totalorder %s665_s18, 3 }
   0x4   : > { %p194_p2 = pnand %p570_p0, %p193_p1 }
   0x5   : > { %s571_s24 = sshll.u32 (!%p194_p2), %s703_s19, 3  ;;  %p239_p4 = scmp.lt.s32.totalorder (!%p194_p2), %s703_s19, 1 }
   0x6   : > { %197 = sbr.rel (%p194_p2) target bundleno = 290 (0x122), region = 32  ;;  %p228_p3 = scmp.lt.s32.totalorder (!%p194_p2), %s571_s24, 15 }
   0xb   : > { %v261_v0 = vld [vmem:[%s795_s1 + $0x40] sm:$0xff]  ;;  %v260_v1 = vld [vmem:[%s795_s1 + $0x38] sm:$0xff]  ;;  %v259_v2 = vld [vmem:[%s795_s1 + $0x30] sm:$0xff]  ;;  %s801_s24 = smov (!%p228_p3, %s571_s24), 15  ;;  %vm269_vm0 = vcmask 588800   ;;  %s803_s19 = smov (!%p239_p4, %s703_s19), 1 }
   0xc   : > { %603 = vmatprep.subr.mxu0 %v261_v0  ;;  %633 = vmatprep.subr.mxu1 %v261_v0  ;;  %v258_v3 = vld [vmem:[%s795_s1 + $0x28] sm:$0xff]  ;;  %s572_s29 = sshll.u32 %s801_s24, 3  ;;  %v257_v4 = vld [vmem:[%s795_s1 + $0x20] sm:$0xff]  ;;  %v256_v5 = vld [vmem:[%s795_s1 + $0x18] sm:$0xff]  ;;  %s241_s27 = scalar_lea.vmem %s798_s4, %s803_s19 }
   0xd   : > { %604 = vmatpush3.msra.mxu0 %v261_v0  ;;  %642 = vmatpush3.msra.mxu1 %v261_v0  ;;  %s731_s9 = scalar_lea.vmem %s794_s0, %s572_s29  ;;  %v255_v6 = vld [vmem:[%s795_s1 + $0x10] sm:$0xff]  ;;  %v254_v8 = vld [vmem:[%s795_s1 + $0x8] sm:$0xff]  ;;  %v253_v9 = vld [vmem:[%s795_s1] sm:$0xff]  ;;  %s769_s25 = scalar_lea.vmem %s797_s3, %s572_s29 }
   0xe   : > { %605 = vmatprep.subr.mxu0 %v260_v1  ;;  %634 = vmatprep.subr.mxu1 %v260_v1  ;;  %v245_v7 = vld [vmem:[%s731_s9] sm:$0xff]  ;;  %v246_v10 = vld [vmem:[%s731_s9 + $0x8] sm:$0xff]  ;;  %v247_v11 = vld [vmem:[%s731_s9 + $0x10] sm:$0xff]  ;;  %s244_s30 = scalar_lea.vmem %s799_s5, %s803_s19 }
   0xf   : > { %606 = vmatpush3.msra.mxu0 %v260_v1  ;;  %643 = vmatpush3.msra.mxu1 %v260_v1  ;;  %v249_v12 = vld [vmem:[%s731_s9 + $0x20] sm:$0xff]  ;;  %v250_v13 = vld [vmem:[%s731_s9 + $0x28] sm:$0xff]  ;;  %v251_v14 = vld [vmem:[%s731_s9 + $0x30] sm:$0xff] }
  0x10   : > { %607 = vmatprep.subr.mxu0 %v259_v2  ;;  %635 = vmatprep.subr.mxu1 %v259_v2  ;;  %v248_v15 = vld [vmem:[%s731_s9 + $0x18] sm:$0xff]  ;;  %v575_v17 = vld [vmem:[%s796_s2] ss:$0 sm:$0xff] }
  0x11   : > { %608 = vmatpush3.msra.mxu0 %v259_v2  ;;  %644 = vmatpush3.msra.mxu1 %v259_v2  ;;  %v252_v16 = vld [vmem:[%s731_s9 + $0x38] sm:$0xff] }
  0x12   : > { %609 = vmatprep.subr.mxu0 %v258_v3  ;;  %636 = vmatprep.subr.mxu1 %v258_v3 }
  0x13   : > { %610 = vmatpush3.msra.mxu0 %v258_v3  ;;  %645 = vmatpush3.msra.mxu1 %v258_v3 }
  0x14   : > { %611 = vmatprep.subr.mxu0 %v257_v4  ;;  %637 = vmatprep.subr.mxu1 %v257_v4 }
  0x15   : > { %612 = vmatpush3.msra.mxu0 %v257_v4  ;;  %646 = vmatpush3.msra.mxu1 %v257_v4 }
  0x16   : > { %613 = vmatprep.subr.mxu0 %v256_v5  ;;  %638 = vmatprep.subr.mxu1 %v256_v5 }
  0x17   : > { %614 = vmatpush3.msra.mxu0 %v256_v5  ;;  %647 = vmatpush3.msra.mxu1 %v256_v5 }
  0x18   : > { %615 = vmatprep.subr.mxu0 %v255_v6  ;;  %621 = vmatprep.mubr.msk.f32.mxu0 %vm269_vm0, %v245_v7 }
  0x19   : > { %616 = vmatpush3.msra.mxu0 %v255_v6  ;;  %639 = vmatprep.subr.mxu1 %v255_v6 }
  0x1a   : > { %617 = vmatprep.subr.mxu0 %v254_v8  ;;  %648 = vmatpush3.msra.mxu1 %v255_v6 }
  0x1b   : > { %618 = vmatpush3.msra.mxu0 %v254_v8  ;;  %640 = vmatprep.subr.mxu1 %v254_v8 }
  0x1c   : > { %619 = vmatprep.subr.mxu0 %v253_v9  ;;  %649 = vmatpush3.msra.mxu1 %v254_v8 }
  0x1d   : > { %620 = vmatpush3.msra.mxu0 %v253_v9  ;;  %641 = vmatprep.subr.mxu1 %v253_v9 }
  0x1e   : > { %622 = vmatmul.mubr.msk.f32.vlgmr.msra.gmra.mxu0 %vm269_vm0, %v246_v10  ;;  %650 = vmatpush3.msra.mxu1 %v253_v9 }
  0x1f   : > { %624 = vmatprep.mubr.msk.f32.mxu0 %vm269_vm0, %v247_v11  ;;  %627 = vmatprep.mubr.msk.f32.mxu1 %vm269_vm0, %v249_v12 }
  0x20   : > { %628 = vmatmul.mubr.msk.f32.vlgmr.msra.gmra.mxu1 %vm269_vm0, %v250_v13 }
  0x21   : > { %630 = vmatprep.mubr.msk.f32.mxu1 %vm269_vm0, %v251_v14 }
  0x22   : > { %625 = vmatmul.mubr.msk.f32.gmra.mxu0 %vm269_vm0, %v248_v15 }
  0x24   : > { %631 = vmatmul.mubr.msk.f32.gmra.mxu1 %vm269_vm0, %v252_v16 }
  0xde   : > { %v623_v18 = vpop.f32.mrf.mxu0 }
  0xdf   : > { %v366_v19 = vadd.f32 %v623_v18, %v575_v17 }
  0xe0   : > { %v360_v20 = vpop.f32.mrf.mxu0  ;;  %v629_v21 = vpop.f32.mrf.mxu1 }
  0xe1   : > { %v400_v22 = vmax.f32 %v366_v19, 0.0  ;;  %v361_v23 = vadd.f32 %v575_v17, %v360_v20  ;;  %v386_v24 = vadd.f32 %v629_v21, %v575_v17 }
  0xe2   : > { %v626_v25 = vpop.f32.mrf.mxu0  ;;  %v380_v26 = vpop.f32.mrf.mxu1 }
  0xe3   : > { %408 = vst [vmem:[%s769_s25 + $0x8] sm:$0xff] %v400_v22  ;;  %v399_v27 = vmax.f32 %v361_v23, 0.0  ;;  %v376_v28 = vadd.f32 %v626_v25, %v575_v17  ;;  %v404_v29 = vmax.f32 %v386_v24, 0.0  ;;  %v381_v30 = vadd.f32 %v575_v17, %v380_v26 }
  0xe4   : > { %v370_v31 = vpop.f32.mrf.mxu0  ;;  %v632_v32 = vpop.f32.mrf.mxu1 }
  0xe5   : > { %407 = vst [vmem:[%s769_s25] sm:$0xff] %v399_v27  ;;  %v402_v33 = vmax.f32 %v376_v28, 0.0  ;;  %v371_v34 = vadd.f32 %v575_v17, %v370_v31  ;;  %412 = vst [vmem:[%s769_s25 + $0x28] sm:$0xff] %v404_v29  ;;  %v403_v35 = vmax.f32 %v381_v30, 0.0  ;;  %v396_v36 = vadd.f32 %v632_v32, %v575_v17 }
  0xe6   : > { %v390_v37 = vpop.f32.mrf.mxu1  ;;  %v415_v38 = vadd.f32 %v400_v22, %v399_v27 }
  0xe7   : > { %410 = vst [vmem:[%s769_s25 + $0x18] sm:$0xff] %v402_v33  ;;  %v401_v39 = vmax.f32 %v371_v34, 0.0  ;;  %411 = vst [vmem:[%s769_s25 + $0x20] sm:$0xff] %v403_v35  ;;  %v391_v40 = vadd.f32 %v575_v17, %v390_v37  ;;  %v406_v41 = vmax.f32 %v396_v36, 0.0 }
  0xe9   : > { %409 = vst [vmem:[%s769_s25 + $0x10] sm:$0xff] %v401_v39  ;;  %v416_v42 = vadd.f32 %v415_v38, %v401_v39  ;;  %v405_v43 = vmax.f32 %v391_v40, 0.0  ;;  %414 = vst [vmem:[%s769_s25 + $0x38] sm:$0xff] %v406_v41 }
  0xeb   : > { %v417_v44 = vadd.f32 %v416_v42, %v402_v33  ;;  %413 = vst [vmem:[%s769_s25 + $0x30] sm:$0xff] %v405_v43 }
  0xed   : > { %v418_v45 = vadd.f32 %v417_v44, %v403_v35 }
  0xef   : > { %v419_v46 = vadd.f32 %v418_v45, %v404_v29 }
  0xf1   : > { %v420_v47 = vadd.f32 %v419_v46, %v405_v43 }
  0xf3   : > { %v421_v48 = vadd.f32 %v420_v47, %v406_v41 }
  0xf5   : > { %v422_v49 = vrot.slane %v421_v48, 4 }
  0xf7   : > { %v423_v50 = vadd.f32 %v422_v49, %v421_v48 }
  0xf9   : > { %v424_v51 = vrot.slane %v423_v50, 2 }
  0xfb   : > { %v425_v52 = vadd.f32 %v424_v51, %v423_v50 }
  0xfd   : > { %v426_v53 = vrot.slane %v425_v52, 1 }
  0xff   : > { %v427_v54 = vadd.f32 %v426_v53, %v425_v52 }
 0x101   : > { %v428_v55 = vmul.f32 0.015625, %v427_v54  ;;  %458 = vst [vmem:[%s241_s27] sm:$0x1] %v427_v54 }
 0x103   : > { %v429_v56 = vsub.f32 %v399_v27, %v428_v55  ;;  %v430_v57 = vsub.f32 %v400_v22, %v428_v55  ;;  %v431_v58 = vsub.f32 %v401_v39, %v428_v55  ;;  %v432_v59 = vsub.f32 %v402_v33, %v428_v55 }
 0x104   : > { %v433_v62 = vsub.f32 %v403_v35, %v428_v55  ;;  %v434_v1 = vsub.f32 %v404_v29, %v428_v55  ;;  %v435_v4 = vsub.f32 %v405_v43, %v428_v55  ;;  %v436_v7 = vsub.f32 %v406_v41, %v428_v55 }
 0x105   : > { %v437_v60 = vmul.f32 %v429_v56, %v429_v56  ;;  %v438_v61 = vmul.f32 %v430_v57, %v430_v57  ;;  %v439_v63 = vmul.f32 %v431_v58, %v431_v58  ;;  %v440_v2 = vmul.f32 %v432_v59, %v432_v59 }
 0x106   : > { %v441_v5 = vmul.f32 %v433_v62, %v433_v62  ;;  %v442_v8 = vmul.f32 %v434_v1, %v434_v1  ;;  %v443_v10 = vmul.f32 %v435_v4, %v435_v4  ;;  %v444_v12 = vmul.f32 %v436_v7, %v436_v7 }
 0x107   : > { %v445_v0 = vadd.f32 %v438_v61, %v437_v60 }
 0x109   : > { %v446_v3 = vadd.f32 %v445_v0, %v439_v63 }
 0x10b   : > { %v447_v6 = vadd.f32 %v446_v3, %v440_v2 }
 0x10d   : > { %v448_v9 = vadd.f32 %v447_v6, %v441_v5 }
 0x10f   : > { %v449_v11 = vadd.f32 %v448_v9, %v442_v8 }
 0x111   : > { %v450_v13 = vadd.f32 %v449_v11, %v443_v10 }
 0x113   : > { %v451_v14 = vadd.f32 %v450_v13, %v444_v12 }
 0x115   : > { %v452_v15 = vrot.slane %v451_v14, 4 }
 0x117   : > { %v453_v16 = vadd.f32 %v452_v15, %v451_v14 }
 0x119   : > { %v454_v17 = vrot.slane %v453_v16, 2 }
 0x11b   : > { %v455_v18 = vadd.f32 %v454_v17, %v453_v16 }
 0x11d   : > { %v456_v19 = vrot.slane %v455_v18, 1 }
 0x11f   : > { %v457_v20 = vadd.f32 %v456_v19, %v455_v18 }
 0x121   : > { %459 = vst [vmem:[%s244_s30] sm:$0x1] %v457_v20 }
 0x122 PF: > { %s16_s18 = sadd.s32 1, %s665_s18  }
 0x123   : > { %p13_p5 = scmp.ge.s32.totalorder %s16_s18, 4  }
 0x125   :  { %15 = sbr.rel (!%p13_p5) target bundleno = 1 (0x1), region = 86 }

</bundles_post_ra>
